<compile_context>
chip_gen: v6e
topology: v6e:2x2x1
jax: 0.10.0
libtpu: 0.0.40
codegen_flags: <defaults>
</compile_context>

<pallas_src>
import functools

import jax
import jax.numpy as jnp
from jax import lax
from jax.experimental import pallas as pl
from jax.experimental.pallas import tpu as pltpu


_LANE = 128
_SUBLANE = 8
_H_ALIGN = 256   # table rows padded to this; K strips (128/256) tile it evenly


def _cdiv(a, b):
    return (a + b - 1) // b


def _round_up(x, m):
    return _cdiv(x, m) * m


# --------------------------------------------------------------------------
# Pallas kernel
# --------------------------------------------------------------------------
def _embedding_bag_sum_kernel(idx_ref, w_ref, out_ref, *, k_chunk):
    """One (b_tile, h_tile) grid step of the mode='sum' bag reduction.

    idx_ref: (b_tile, L)      int32   remapped (compressed-table) indices
    w_ref:   (h_tile, d_pad)  float32 tile of the padded hashed weight table
    out_ref: (b_tile, d_pad)  float32 bag sums (resident across the H axis,
                                      used directly as the accumulator)
    """
    h = pl.program_id(1)

    @pl.when(h == 0)
    def _init():
        out_ref[...] = jnp.zeros_like(out_ref)

    b_tile, num_lookups = idx_ref.shape
    h_tile = w_ref.shape[0]
    num_chunks = h_tile // k_chunk

    idx = idx_ref[...]                                  # (b_tile, L)
    tile_base = h * h_tile
    # (1, k_chunk) iota; the compares below broadcast it against (b_tile, 1)
    # index columns, so no full (b_tile, k_chunk) iota constant stays live.
    k_iota = lax.broadcasted_iota(jnp.int32, (1, k_chunk), 1)

    def accumulate_chunk(start):
        # Indices local to this K strip; anything outside [0, k_chunk) never
        # matches the iota, so rows belonging to other strips contribute 0.
        local = idx - (tile_base + start)                        # (b_tile, L)
        counts = (local[:, 0:1] == k_iota).astype(jnp.int32)     # (b_tile, k_chunk)
        for l in range(1, num_lookups):                          # L is small/static
            counts = counts + (local[:, l:l + 1] == k_iota).astype(jnp.int32)
        # counts are exact small integers (<= L); cast once, MXU f32 matmul.
        # TODO(synk): if MXU-bound (large D, large h_tile) on v6e/v7x, cast
        # counts to bf16 (exact) and feed W as a bf16 hi/lo split for ~2-3x
        # MXU throughput at ~f32 accuracy.
        out_ref[...] += jnp.dot(counts.astype(jnp.float32),
                                w_ref[pl.ds(start, k_chunk), :],
                                preferred_element_type=jnp.float32)

    if num_chunks <= 8:
        for c in range(num_chunks):              # short: fully unrolled
            accumulate_chunk(c * k_chunk)
    else:
        def body(c, carry):                      # long: bound live ranges
            accumulate_chunk(pl.multiple_of(c * k_chunk, k_chunk))
            return carry
        lax.fori_loop(0, num_chunks, body, 0)


# --------------------------------------------------------------------------
# Tile / VMEM-budget selection (per TPU generation)
# --------------------------------------------------------------------------
def _hw_params():
    try:
        kind = jax.devices()[0].device_kind.lower()
    except Exception:  # pragma: no cover - defensive default
        kind = ""
    is_v5 = "v5" in kind
    is_v7 = ("v7" in kind) or ("tpu7" in kind)
    b_tile_max = 128 if is_v5 else 256                  # v5e MXU is 128-wide
    resident_budget = (40 << 20) if is_v7 else (64 << 20)   # v7x: 64 MiB phys VMEM
    vmem_cap = (48 << 20) if is_v7 else (96 << 20)
    split_b_for_cores = is_v7                           # 2 TensorCores per v7x chip
    return b_tile_max, resident_budget, vmem_cap, split_b_for_cores


def _choose_b_tile(B, b_tile_max, split_b_for_cores):
    b_eff = _round_up(max(B, 1), _SUBLANE)
    if split_b_for_cores and B > _SUBLANE:
        # Guarantee >= 2 B tiles so both v7x TensorCores get work.
        b_tile_max = min(b_tile_max, _round_up(_cdiv(B, 2), _SUBLANE))
    if b_eff <= b_tile_max:
        return b_eff
    # Pick from {max, max/2} to minimize wasted (padded) rows; prefer larger.
    half = max(_SUBLANE, (b_tile_max // 2 // _SUBLANE) * _SUBLANE)
    best_tile, best_padded = None, None
    for t in sorted({b_tile_max, half}, reverse=True):
        padded = _round_up(B, t)
        if best_padded is None or padded < best_padded:
            best_tile, best_padded = t, padded
    return best_tile


def _choose_h_tile(h_pad, d_pad, b_tile, L, resident_budget):
    """Single resident H tile if the table fits the budget; otherwise the
    largest streaming tile (multiple of _H_ALIGN that divides h_pad) that
    double-buffers within the remaining budget."""
    fixed = 2 * b_tile * d_pad * 4 + 2 * b_tile * L * 4 + (4 << 20)
    table_bytes = h_pad * d_pad * 4
    if fixed + 2 * table_bytes <= resident_budget:
        return h_pad, True
    avail = max(resident_budget - fixed, 2 * _H_ALIGN * d_pad * 4)
    max_rows = max(_H_ALIGN, (avail // (2 * d_pad * 4)) // _H_ALIGN * _H_ALIGN)
    m = h_pad // _H_ALIGN
    best = 1
    d = 1
    while d * d <= m:
        if m % d == 0:
            for f in (d, m // d):
                if f * _H_ALIGN <= max_rows:
                    best = max(best, f)
        d += 1
    return best * _H_ALIGN, False


# --------------------------------------------------------------------------
# pallas_call wrapper
# --------------------------------------------------------------------------
def _bag_sum_pallas(hashed_idx, padded_weight):
    """Tiled embedding-bag 'sum' over 2-D remapped indices (one bag per row).

    hashed_idx:    (B, L) int32 values in [0, H)
    padded_weight: (h_pad, d_pad) float32 with h_pad % 256 == 0, d_pad % 128 == 0
    returns:       (B, d_pad) float32
    """
    B, L = hashed_idx.shape
    h_pad, d_pad = padded_weight.shape
    assert h_pad % _H_ALIGN == 0 and d_pad % _LANE == 0, (
        "padded_weight must come from pad_hashed_weight()")

    b_tile_max, resident_budget, vmem_cap, split_b = _hw_params()
    b_tile = _choose_b_tile(B, b_tile_max, split_b)
    b_pad = _round_up(B, b_tile)
    h_tile, _resident = _choose_h_tile(h_pad, d_pad, b_tile, L, resident_budget)
    # Counts strip sized so the live int32 slab is <= 32 vregs (128 KiB).
    k_chunk = 128 if b_tile > 128 else 256
    k_chunk = min(k_chunk, h_tile)

    idx = hashed_idx.astype(jnp.int32)
    if b_pad != B:
        idx = jnp.zeros((b_pad, L), jnp.int32).at[:B, :].set(idx)

    grid = (b_pad // b_tile, h_pad // h_tile)

    est_vmem = (2 * h_tile * d_pad * 4        # double-buffered weight tile(s)
                + 2 * b_tile * d_pad * 4      # double-buffered output block
                + 2 * b_tile * L * 4          # double-buffered index block
                + 4 * b_tile * k_chunk * 4)   # counts strips / temporaries
    vmem_limit = int(min(max(32 << 20, est_vmem + (8 << 20)), vmem_cap))

    kernel = functools.partial(_embedding_bag_sum_kernel, k_chunk=k_chunk)

    out = pl.pallas_call(
        kernel,
        out_shape=jax.ShapeDtypeStruct((b_pad, d_pad), jnp.float32),
        grid_spec=pltpu.PrefetchScalarGridSpec(
            num_scalar_prefetch=0,
            grid=grid,
            in_specs=[
                # Per-B-tile indices; constant across the H (reduction) axis.
                pl.BlockSpec((b_tile, L), lambda b, h: (b, 0)),
                # Weight tile; constant across the B axis. In the resident
                # case (single H tile) it is DMA'd from HBM exactly once and
                # stays in VMEM for the whole grid.
                # TODO(synk): on v5e in the streaming case, pipeline_mode=
                # pl.Buffered(3) here would hide more of the W stream.
                pl.BlockSpec((h_tile, d_pad), lambda b, h: (h, 0)),
            ],
            out_specs=pl.BlockSpec((b_tile, d_pad), lambda b, h: (b, 0)),
        ),
        compiler_params=pltpu.CompilerParams(
            dimension_semantics=("parallel", "arbitrary"),
            vmem_limit_bytes=vmem_limit,
        ),
    )(idx, padded_weight)

    return out[:B, :]


def _forward_impl(x, padded_weight, weight_idx, *, embedding_dim):
    # TODO(synk): 1-D x + offsets and mode='mean'/'max' paths not implemented;
    # the module default (2-D x, offsets=None, mode='sum') is covered.
    hashed_idx = weight_idx[x].astype(jnp.int32)      # vocab -> compressed rows
    out = _bag_sum_pallas(hashed_idx, padded_weight)
    return out[:, :embedding_dim]


# --------------------------------------------------------------------------
# Module-level init helpers (host-side, run once)
# --------------------------------------------------------------------------
_PRIME32_1 = 2654435761
_PRIME32_2 = 2246822519
_PRIME32_3 = 3266489917
_PRIME32_4 = 668265263
_PRIME32_5 = 374761393
_MASK32 = 0xFFFFFFFF


def _rotl32(x, r):
    return ((x << r) | (x >> (32 - r))) & _MASK32


def _xxh32(data, seed=0):
    """Pure-Python xxHash32 (matches xxhash.xxh32(key, seed).intdigest())."""
    n, i = len(data), 0
    if n >= 16:
        v1 = (seed + _PRIME32_1 + _PRIME32_2) & _MASK32
        v2 = (seed + _PRIME32_2) & _MASK32
        v3 = seed & _MASK32
        v4 = (seed - _PRIME32_1) & _MASK32
        while i <= n - 16:
            vs = [v1, v2, v3, v4]
            for j in range(4):
                w = int.from_bytes(data[i:i + 4], "little")
                i += 4
                vs[j] = (_rotl32((vs[j] + w * _PRIME32_2) & _MASK32, 13)
                         * _PRIME32_1) & _MASK32
            v1, v2, v3, v4 = vs
        h = (_rotl32(v1, 1) + _rotl32(v2, 7) + _rotl32(v3, 12)
             + _rotl32(v4, 18)) & _MASK32
    else:
        h = (seed + _PRIME32_5) & _MASK32
    h = (h + n) & _MASK32
    while i <= n - 4:
        w = int.from_bytes(data[i:i + 4], "little")
        i += 4
        h = (_rotl32((h + w * _PRIME32_3) & _MASK32, 17) * _PRIME32_4) & _MASK32
    while i < n:
        h = (_rotl32((h + data[i] * _PRIME32_5) & _MASK32, 11) * _PRIME32_1) & _MASK32
        i += 1
    h ^= h >> 15
    h = (h * _PRIME32_2) & _MASK32
    h ^= h >> 13
    h = (h * _PRIME32_3) & _MASK32
    h ^= h >> 16
    return h


def xxhash_idx(hN, size_out, extra_str="idxW", seed=2):
    """Module default: weight_idx[i] = xxh32(f"{i}_{extra_str}", seed) % hN."""
    return jnp.asarray(
        [_xxh32("{}_{}".format(i, extra_str).encode(), seed) % hN
         for i in range(size_out)], dtype=jnp.int32)


def uni_hash_idx(hN, size_out):
    """Module's deterministic uni_hash_func alternative."""
    return jnp.asarray([(i * 32452843 % 512927357) % hN for i in range(size_out)],
                       dtype=jnp.int32)


def pad_hashed_weight(hashed_weight):
    """One-time pad of the table to (multiple of 256 rows, multiple of 128 cols)
    so the per-call hot path never re-pads / re-copies it in HBM."""
    H, D = hashed_weight.shape
    h_pad = _round_up(max(H, 1), _H_ALIGN)
    d_pad = _round_up(max(D, 1), _LANE)
    w = hashed_weight.astype(jnp.float32)
    if (h_pad, d_pad) != (H, D):
        w = jnp.zeros((h_pad, d_pad), jnp.float32).at[:H, :D].set(w)
    return w


class HashVectorEmbeddingBag:
    """JAX/Pallas port of the PyTorch module (forward = embedding_bag 'sum')."""

    def __init__(self, num_embeddings, embedding_dim, compression=1.0,
                 hash_seed=2, mode="sum", key=None, _weight=None):
        if mode != "sum":
            raise NotImplementedError("only mode='sum' is implemented")
        self.num_embeddings = num_embeddings
        self.embedding_dim = embedding_dim
        self.compression = compression
        self.hash_seed = hash_seed
        if _weight is None:
            self.hashed_weight_size = max(int(num_embeddings * compression), 1)
            bound = (1.0 / num_embeddings) ** 0.5
            if key is None:
                key = jax.random.PRNGKey(0)
            self.hashed_weight = jax.random.uniform(
                key, (self.hashed_weight_size, embedding_dim),
                dtype=jnp.float32, minval=-bound, maxval=bound)
        else:
            self.hashed_weight = jnp.asarray(_weight, jnp.float32)
            self.hashed_weight_size = self.hashed_weight.shape[0]
        # Module default: xxhash-based vocab -> compressed-row mapping.
        self.weight_idx = xxhash_idx(self.hashed_weight_size, num_embeddings,
                                     "idxW", hash_seed)
        # Pad ONCE at init; every forward reuses this padded copy (no per-call
        # HBM read+write of the table just to pad it).
        self._padded_weight = pad_hashed_weight(self.hashed_weight)
        self._forward = jax.jit(
            functools.partial(_forward_impl, embedding_dim=embedding_dim))

    def __call__(self, x, offsets=None):
        if offsets is not None:
            # TODO(synk): 1-D x + offsets path not implemented.
            raise NotImplementedError("offsets=None (2-D x) only")
        return self._forward(x, self._padded_weight, self.weight_idx)


if __name__ == "__main__":
    num_embeddings = 64
    embedding_dim = 32
    compression = 0.5          # -> hashed table of 32 rows
    B, L = 2, 8                # 2 bags, 8 indices per bag

    key = jax.random.PRNGKey(0)
    k_w, k_x = jax.random.split(key)

    emb = HashVectorEmbeddingBag(num_embeddings, embedding_dim, compression,
                                 hash_seed=2, key=k_w)
    x = jax.random.randint(k_x, (B, L), 0, num_embeddings, dtype=jnp.int32)

    out = emb(x)
    out = jax.block_until_ready(out)

    # Pure-JAX reference of F.embedding_bag(x, W[weight_idx], mode='sum')
    ref = jnp.sum(emb.hashed_weight[emb.weight_idx[x]], axis=1)

    assert out.shape == (B, embedding_dim)
    assert out.dtype == jnp.float32
    assert jnp.allclose(out, ref, atol=1e-5, rtol=1e-5)
    print("KERNEL_OK")
</pallas_src>

<mosaic_0001>
module attributes {stable_mosaic.version = 11 : i64} {
  func.func @_embedding_bag_sum_kernel(%arg0: i32, %arg1: i32, %arg2: memref<8x8xi32, #tpu.memory_space<vmem>>, %arg3: memref<256x128xf32, #tpu.memory_space<vmem>>, %arg4: memref<8x128xf32, #tpu.memory_space<vmem>>) attributes {dimension_semantics = [#tpu.dimension_semantics<parallel>, #tpu.dimension_semantics<arbitrary>], iteration_bounds = array<i64: 1, 1>, scalar_prefetch = 0 : i64, scratch_operands = 0 : i64, tpu.core_type = #tpu.core_type<tc>, window_params = [{transform_indices = @transform_0, window_bounds = array<i64: 8, 8>}, {transform_indices = @transform_1, window_bounds = array<i64: 256, 128>}, {transform_indices = @transform_2, window_bounds = array<i64: 8, 128>}]} {
    %c0_i32 = arith.constant 0 : i32
    %0 = arith.cmpi eq, %arg1, %c0_i32 : i32
    %1 = arith.extui %0 : i1 to i32
    %c0_i32_0 = arith.constant 0 : i32
    %2 = arith.cmpi ne, %1, %c0_i32_0 : i32
    scf.if %2 {
      %cst_9 = arith.constant 0.000000e+00 : f32
      %62 = vector.broadcast %cst_9 : f32 to vector<8x128xf32>
      %c0_10 = arith.constant 0 : index
      %c0_11 = arith.constant 0 : index
      %63 = vector.load %arg4[%c0_10, %c0_11] : memref<8x128xf32, #tpu.memory_space<vmem>>, vector<8x128xf32>
      tpu.vector_store %arg4[%c0_10, %c0_11], %62 {strides = array<i32>} : memref<8x128xf32, #tpu.memory_space<vmem>>, vector<8x128xf32>,
    } else {
    }
    %c0 = arith.constant 0 : index
    %c0_1 = arith.constant 0 : index
    %3 = vector.load %arg2[%c0, %c0_1] : memref<8x8xi32, #tpu.memory_space<vmem>>, vector<8x8xi32>
    %c256_i32 = arith.constant 256 : i32
    %4 = arith.muli %arg1, %c256_i32 : i32
    %5 = tpu.iota {dimensions = array<i32: 1>} : vector<1x256xi32>
    %c0_i32_2 = arith.constant 0 : i32
    %6 = arith.addi %4, %c0_i32_2 : i32
    %7 = vector.broadcast %6 : i32 to vector<8x8xi32>
    %8 = arith.subi %3, %7 : vector<8x8xi32>
    %9 = vector.extract_strided_slice %8 {offsets = [0, 0], sizes = [8, 1], strides = [1, 1]} : vector<8x8xi32> to vector<8x1xi32>
    %10 = vector.broadcast %9 : vector<8x1xi32> to vector<8x256xi32>
    %11 = vector.broadcast %5 : vector<1x256xi32> to vector<8x256xi32>
    %12 = arith.cmpi eq, %10, %11 : vector<8x256xi32>
    %13 = arith.extui %12 : vector<8x256xi1> to vector<8x256xi32>
    %14 = vector.extract_strided_slice %8 {offsets = [0, 1], sizes = [8, 1], strides = [1, 1]} : vector<8x8xi32> to vector<8x1xi32>
    %15 = vector.broadcast %14 : vector<8x1xi32> to vector<8x256xi32>
    %16 = vector.broadcast %5 : vector<1x256xi32> to vector<8x256xi32>
    %17 = arith.cmpi eq, %15, %16 : vector<8x256xi32>
    %18 = arith.extui %17 : vector<8x256xi1> to vector<8x256xi32>
    %19 = arith.addi %13, %18 : vector<8x256xi32>
    %20 = vector.extract_strided_slice %8 {offsets = [0, 2], sizes = [8, 1], strides = [1, 1]} : vector<8x8xi32> to vector<8x1xi32>
    %21 = vector.broadcast %20 : vector<8x1xi32> to vector<8x256xi32>
    %22 = vector.broadcast %5 : vector<1x256xi32> to vector<8x256xi32>
    %23 = arith.cmpi eq, %21, %22 : vector<8x256xi32>
    %24 = arith.extui %23 : vector<8x256xi1> to vector<8x256xi32>
    %25 = arith.addi %19, %24 : vector<8x256xi32>
    %26 = vector.extract_strided_slice %8 {offsets = [0, 3], sizes = [8, 1], strides = [1, 1]} : vector<8x8xi32> to vector<8x1xi32>
    %27 = vector.broadcast %26 : vector<8x1xi32> to vector<8x256xi32>
    %28 = vector.broadcast %5 : vector<1x256xi32> to vector<8x256xi32>
    %29 = arith.cmpi eq, %27, %28 : vector<8x256xi32>
    %30 = arith.extui %29 : vector<8x256xi1> to vector<8x256xi32>
    %31 = arith.addi %25, %30 : vector<8x256xi32>
    %32 = vector.extract_strided_slice %8 {offsets = [0, 4], sizes = [8, 1], strides = [1, 1]} : vector<8x8xi32> to vector<8x1xi32>
    %33 = vector.broadcast %32 : vector<8x1xi32> to vector<8x256xi32>
    %34 = vector.broadcast %5 : vector<1x256xi32> to vector<8x256xi32>
    %35 = arith.cmpi eq, %33, %34 : vector<8x256xi32>
    %36 = arith.extui %35 : vector<8x256xi1> to vector<8x256xi32>
    %37 = arith.addi %31, %36 : vector<8x256xi32>
    %38 = vector.extract_strided_slice %8 {offsets = [0, 5], sizes = [8, 1], strides = [1, 1]} : vector<8x8xi32> to vector<8x1xi32>
    %39 = vector.broadcast %38 : vector<8x1xi32> to vector<8x256xi32>
    %40 = vector.broadcast %5 : vector<1x256xi32> to vector<8x256xi32>
    %41 = arith.cmpi eq, %39, %40 : vector<8x256xi32>
    %42 = arith.extui %41 : vector<8x256xi1> to vector<8x256xi32>
    %43 = arith.addi %37, %42 : vector<8x256xi32>
    %44 = vector.extract_strided_slice %8 {offsets = [0, 6], sizes = [8, 1], strides = [1, 1]} : vector<8x8xi32> to vector<8x1xi32>
    %45 = vector.broadcast %44 : vector<8x1xi32> to vector<8x256xi32>
    %46 = vector.broadcast %5 : vector<1x256xi32> to vector<8x256xi32>
    %47 = arith.cmpi eq, %45, %46 : vector<8x256xi32>
    %48 = arith.extui %47 : vector<8x256xi1> to vector<8x256xi32>
    %49 = arith.addi %43, %48 : vector<8x256xi32>
    %50 = vector.extract_strided_slice %8 {offsets = [0, 7], sizes = [8, 1], strides = [1, 1]} : vector<8x8xi32> to vector<8x1xi32>
    %51 = vector.broadcast %50 : vector<8x1xi32> to vector<8x256xi32>
    %52 = vector.broadcast %5 : vector<1x256xi32> to vector<8x256xi32>
    %53 = arith.cmpi eq, %51, %52 : vector<8x256xi32>
    %54 = arith.extui %53 : vector<8x256xi1> to vector<8x256xi32>
    %55 = arith.addi %49, %54 : vector<8x256xi32>
    %c0_3 = arith.constant 0 : index
    %c0_4 = arith.constant 0 : index
    %56 = vector.load %arg4[%c0_3, %c0_4] : memref<8x128xf32, #tpu.memory_space<vmem>>, vector<8x128xf32>
    %57 = arith.sitofp %55 : vector<8x256xi32> to vector<8x256xf32>
    %c0_5 = arith.constant 0 : index
    %c0_6 = arith.constant 0 : index
    %58 = vector.load %arg3[%c0_5, %c0_6] : memref<256x128xf32, #tpu.memory_space<vmem>>, vector<256x128xf32>
    %cst = arith.constant dense<0.000000e+00> : vector<8x128xf32>
    %59 = tpu.matmul %57, %58, %cst {dimension_numbers = #tpu.dot_dimension_numbers<[1], [0], [0], [1], [0, 0, 1, 1], [], []>} : vector<8x256xf32>, vector<256x128xf32>, vector<8x128xf32> -> vector<8x128xf32>
    %60 = arith.addf %56, %59 : vector<8x128xf32>
    %c0_7 = arith.constant 0 : index
    %c0_8 = arith.constant 0 : index
    %61 = vector.load %arg4[%c0_7, %c0_8] : memref<8x128xf32, #tpu.memory_space<vmem>>, vector<8x128xf32>
    tpu.vector_store %arg4[%c0_7, %c0_8], %60 {strides = array<i32>} : memref<8x128xf32, #tpu.memory_space<vmem>>, vector<8x128xf32>,
    return
  }
  func.func @transform_0(%arg0: i32, %arg1: i32) -> (i32, i32) {
    %c0_i32 = arith.constant 0 : i32
    %c0_i32_0 = arith.constant 0 : i32
    return %arg0, %c0_i32 : i32, i32
  }
  func.func @transform_1(%arg0: i32, %arg1: i32) -> (i32, i32) {
    %c0_i32 = arith.constant 0 : i32
    %c0_i32_0 = arith.constant 0 : i32
    return %arg1, %c0_i32 : i32, i32
  }
  func.func @transform_2(%arg0: i32, %arg1: i32) -> (i32, i32) {
    %c0_i32 = arith.constant 0 : i32
    %c0_i32_0 = arith.constant 0 : i32
    return %arg0, %c0_i32 : i32, i32
  }
}

</mosaic_0001>

<bundles_post_ra>
// kernel: _forward_impl.1
= control target key start
LH: loop header
LB: loop body
LE: loop exit
PB: predicated region body
PF: predicated region fallthrough
CT: control target
= control target key end

     0   :  { %v257_v0 = vmov 2   ;;  %v258_v1 = vmov 0   ;;  %v259_v7 = vmov 3   ;;  %v260_v8 = vmov 1   ;;  %s399_s0 = inlined_call_operand.vmem [shape: s32[8,8], index: 0, kind: input, shape index: {}]   ;;  %s400_s1 = inlined_call_operand.vmem [shape: f32[256,128], index: 1, kind: input, shape index: {}]   ;;  %s401_s2 = inlined_call_operand.vmem [shape: f32[8,128], index: 2, kind: output, shape index: {}]  }
   0x1   :  { %250 = vset.pattern.permute.xlu1 %v257_v0  ;;  %248 = vset.pattern.permute.xlu0 %v258_v1  ;;  %v16_v2 = vld [vmem:[%s399_s0] sm:$0xff]  ;;  %v127_v3 = vld [vmem:[%s400_s1 + $0xf8] sm:$0xff]  ;;  %v126_v5 = vld [vmem:[%s400_s1 + $0xf0] sm:$0xff]  ;;  %v261_v12 = vmov 4   ;;  %v262_v13 = vmov 5   ;;  %v263_v19 = vmov 6   ;;  %v18_v41 = vlaneseq }
   0x2   :  { %40 = vperm.xlu1 %250, %v16_v2   ;;  %24 = vperm.xlu0 %248, %v16_v2   ;;  %v111_v4 = vld [vmem:[%s400_s1 + $0x78] sm:$0xff]  ;;  %v110_v6 = vld [vmem:[%s400_s1 + $0x70] sm:$0xff]  ;;  %v125_v9 = vld [vmem:[%s400_s1 + $0xe8] sm:$0xff]  ;;  %v264_v23 = vmov 7  }
   0x3   :  { %204 = vmatprep.subr.mxu0 %v127_v3  ;;  %v109_v10 = vld [vmem:[%s400_s1 + $0x68] sm:$0xff]  ;;  %v124_v11 = vld [vmem:[%s400_s1 + $0xe0] sm:$0xff]  ;;  %v123_v15 = vld [vmem:[%s400_s1 + $0xd8] sm:$0xff]  ;;  %v19_v42 = vand.u32 127, %v18_v41 }
   0x4   :  { %205 = vmatpush3.msra.mxu0 %v111_v4  ;;  %v108_v14 = vld [vmem:[%s400_s1 + $0x60] sm:$0xff]  ;;  %v107_v16 = vld [vmem:[%s400_s1 + $0x58] sm:$0xff]  ;;  %v122_v17 = vld [vmem:[%s400_s1 + $0xd0] sm:$0xff] }
   0x5   :  { %206 = vmatprep.subr.mxu0 %v126_v5  ;;  %v106_v18 = vld [vmem:[%s400_s1 + $0x50] sm:$0xff]  ;;  %v121_v20 = vld [vmem:[%s400_s1 + $0xc8] sm:$0xff]  ;;  %v120_v22 = vld [vmem:[%s400_s1 + $0xc0] sm:$0xff]  ;;  %v20_v45 = vadd.s32 128, %v19_v42 }
   0x6   :  { %251 = vset.pattern.permute.xlu1 %v259_v7  ;;  %249 = vset.pattern.permute.xlu0 %v260_v8  ;;  %v105_v21 = vld [vmem:[%s400_s1 + $0x48] sm:$0xff]  ;;  %v104_v24 = vld [vmem:[%s400_s1 + $0x40] sm:$0xff]  ;;  %v119_v25 = vld [vmem:[%s400_s1 + $0xb8] sm:$0xff] }
   0x7   :  { %49 = vperm.xlu1 %251, %v16_v2   ;;  %31 = vperm.xlu0 %249, %v16_v2   ;;  %v103_v26 = vld [vmem:[%s400_s1 + $0x38] sm:$0xff]  ;;  %v118_v27 = vld [vmem:[%s400_s1 + $0xb0] sm:$0xff]  ;;  %v117_v29 = vld [vmem:[%s400_s1 + $0xa8] sm:$0xff] }
   0x8   :  { %207 = vmatpush3.msra.mxu0 %v110_v6  ;;  %v102_v28 = vld [vmem:[%s400_s1 + $0x30] sm:$0xff]  ;;  %v101_v30 = vld [vmem:[%s400_s1 + $0x28] sm:$0xff]  ;;  %v116_v31 = vld [vmem:[%s400_s1 + $0xa0] sm:$0xff] }
   0x9   :  { %208 = vmatprep.subr.mxu0 %v125_v9  ;;  %v100_v32 = vld [vmem:[%s400_s1 + $0x20] sm:$0xff]  ;;  %v115_v33 = vld [vmem:[%s400_s1 + $0x98] sm:$0xff]  ;;  %v114_v35 = vld [vmem:[%s400_s1 + $0x90] sm:$0xff] }
   0xa   :  { %209 = vmatpush3.msra.mxu0 %v109_v10  ;;  %v99_v34 = vld [vmem:[%s400_s1 + $0x18] sm:$0xff]  ;;  %v98_v36 = vld [vmem:[%s400_s1 + $0x10] sm:$0xff]  ;;  %v113_v37 = vld [vmem:[%s400_s1 + $0x88] sm:$0xff] }
   0xb   :  { %252 = vset.pattern.permute.xlu1 %v261_v12  ;;  %253 = vset.pattern.permute.xlu0 %v262_v13  ;;  %v97_v38 = vld [vmem:[%s400_s1 + $0x8] sm:$0xff]  ;;  %v112_v39 = vld [vmem:[%s400_s1 + $0x80] sm:$0xff] }
   0xc   :  { %58 = vperm.xlu1 %252, %v16_v2   ;;  %67 = vperm.xlu0 %253, %v16_v2   ;;  %v96_v40 = vld [vmem:[%s400_s1] sm:$0xff] }
   0xd   :  { %210 = vmatprep.subr.mxu0 %v124_v11 }
   0xe   :  { %211 = vmatpush3.msra.mxu0 %v108_v14 }
   0xf   :  { %212 = vmatprep.subr.mxu0 %v123_v15 }
  0x10   :  { %254 = vset.pattern.permute.xlu1 %v263_v19  ;;  %213 = vmatpush3.msra.mxu0 %v107_v16 }
  0x11   :  { %76 = vperm.xlu1 %254, %v16_v2   ;;  %214 = vmatprep.subr.mxu0 %v122_v17 }
  0x12   :  { %215 = vmatpush3.msra.mxu0 %v106_v18  ;;  %256 = vset.pattern.permute.xlu0 %v264_v23 }
  0x13   :  { %216 = vmatprep.subr.mxu0 %v121_v20 }
  0x14   :  { %217 = vmatpush3.msra.mxu0 %v105_v21 }
  0x15   :  { %255 = vset.pattern.permute.xlu1 %v264_v23  ;;  %218 = vmatprep.subr.mxu0 %v120_v22 }
  0x16   :  { %85 = vperm.xlu1 %255, %v16_v2   ;;  %219 = vmatpush3.msra.mxu0 %v104_v24 }
  0x17   :  { %220 = vmatprep.subr.mxu0 %v119_v25 }
  0x18   :  { %221 = vmatpush3.msra.mxu0 %v103_v26 }
  0x19   :  { %222 = vmatprep.subr.mxu0 %v118_v27 }
  0x1a   :  { %223 = vmatpush3.msra.mxu0 %v102_v28 }
  0x1b   :  { %224 = vmatprep.subr.mxu0 %v117_v29 }
  0x1c   :  { %225 = vmatpush3.msra.mxu0 %v101_v30 }
  0x1d   :  { %226 = vmatprep.subr.mxu0 %v116_v31 }
  0x1e   :  { %227 = vmatpush3.msra.mxu0 %v100_v32 }
  0x1f   :  { %228 = vmatprep.subr.mxu0 %v115_v33 }
  0x20   :  { %229 = vmatpush3.msra.mxu0 %v99_v34 }
  0x21   :  { %230 = vmatprep.subr.mxu0 %v114_v35 }
  0x22   :  { %231 = vmatpush3.msra.mxu0 %v98_v36 }
  0x23   :  { %232 = vmatprep.subr.mxu0 %v113_v37 }
  0x24   :  { %233 = vmatpush3.msra.mxu0 %v97_v38 }
  0x25   :  { %234 = vmatprep.subr.mxu0 %v112_v39 }
  0x26   :  { %235 = vmatpush3.msra.mxu0 %v96_v40 }
  0x7d   :  { %v41_v43 = vpop.permute.xlu1 %40  ;;  %v25_v44 = vpop.permute.xlu0 %24 }
  0x7e   :  { %vm26_vm0 = vcmp.eq.s32.totalorder %v25_v44, %v19_v42  ;;  %vm27_vm1 = vcmp.eq.s32.totalorder %v25_v44, %v20_v45  ;;  %vm42_vm2 = vcmp.eq.s32.totalorder %v41_v43, %v19_v42  ;;  %vm43_vm3 = vcmp.eq.s32.totalorder %v41_v43, %v20_v45 }
  0x7f   :  { %v28_v48 = vsel %vm26_vm0, 1, %v258_v1  ;;  %v29_v49 = vsel %vm27_vm1, 1, %v258_v1  ;;  %v44_v54 = vsel %vm42_vm2, 1, %v258_v1  ;;  %v45_v55 = vsel %vm43_vm3, 1, %v258_v1 }
  0x82   :  { %v50_v46 = vpop.permute.xlu1 %49  ;;  %v32_v47 = vpop.permute.xlu0 %31 }
  0x83   :  { %vm33_vm4 = vcmp.eq.s32.totalorder %v32_v47, %v19_v42  ;;  %vm34_vm5 = vcmp.eq.s32.totalorder %v32_v47, %v20_v45  ;;  %vm51_vm6 = vcmp.eq.s32.totalorder %v50_v46, %v19_v42  ;;  %vm52_vm7 = vcmp.eq.s32.totalorder %v50_v46, %v20_v45 }
  0x84   :  { %v35_v50 = vsel %vm33_vm4, 1, %v258_v1  ;;  %v36_v51 = vsel %vm34_vm5, 1, %v258_v1  ;;  %v53_v56 = vsel %vm51_vm6, 1, %v258_v1  ;;  %v54_v57 = vsel %vm52_vm7, 1, %v258_v1 }
  0x85   :  { %v37_v52 = vadd.s32 %v35_v50, %v28_v48  ;;  %v38_v53 = vadd.s32 %v36_v51, %v29_v49 }
  0x87   :  { %v46_v58 = vadd.s32 %v44_v54, %v37_v52  ;;  %v47_v59 = vadd.s32 %v45_v55, %v38_v53  ;;  %v59_v60 = vpop.permute.xlu1 %58  ;;  %v68_v61 = vpop.permute.xlu0 %67 }
  0x88   :  { %vm60_vm8 = vcmp.eq.s32.totalorder %v59_v60, %v19_v42  ;;  %vm61_vm9 = vcmp.eq.s32.totalorder %v59_v60, %v20_v45  ;;  %vm69_vm10 = vcmp.eq.s32.totalorder %v68_v61, %v19_v42  ;;  %vm70_vm11 = vcmp.eq.s32.totalorder %v68_v61, %v20_v45 }
  0x89   :  { %v55_v62 = vadd.s32 %v53_v56, %v46_v58  ;;  %v56_v63 = vadd.s32 %v54_v57, %v47_v59  ;;  %v62_v0 = vsel %vm60_vm8, 1, %v258_v1  ;;  %v63_v2 = vsel %vm61_vm9, 1, %v258_v1 }
  0x8a   :  { %v71_v5 = vsel %vm69_vm10, 1, %v258_v1  ;;  %v72_v6 = vsel %vm70_vm11, 1, %v258_v1 }
  0x8b   :  { %v64_v3 = vadd.s32 %v62_v0, %v55_v62  ;;  %v65_v4 = vadd.s32 %v63_v2, %v56_v63 }
  0x8c   :  { %v77_v7 = vpop.permute.xlu1 %76 }
  0x8d   :  { %vm78_vm12 = vcmp.eq.s32.totalorder %v77_v7, %v19_v42  ;;  %vm79_vm13 = vcmp.eq.s32.totalorder %v77_v7, %v20_v45  ;;  %v73_v8 = vadd.s32 %v71_v5, %v64_v3  ;;  %v74_v9 = vadd.s32 %v72_v6, %v65_v4 }
  0x8e   :  { %v80_v10 = vsel %vm78_vm12, 1, %v258_v1  ;;  %v81_v11 = vsel %vm79_vm13, 1, %v258_v1 }
  0x8f   :  { %v82_v13 = vadd.s32 %v80_v10, %v73_v8  ;;  %v83_v14 = vadd.s32 %v81_v11, %v74_v9 }
  0x91   :  { %v86_v12 = vpop.permute.xlu1 %85 }
  0x92   :  { %vm87_vm14 = vcmp.eq.s32.totalorder %v86_v12, %v19_v42  ;;  %vm88_vm15 = vcmp.eq.s32.totalorder %v86_v12, %v20_v45 }
  0x93   :  { %v89_v15 = vsel %vm87_vm14, 1, %v258_v1  ;;  %v90_v16 = vsel %vm88_vm15, 1, %v258_v1 }
  0x94   :  { %v91_v17 = vadd.s32 %v89_v15, %v82_v13  ;;  %v92_v18 = vadd.s32 %v90_v16, %v83_v14 }
  0x96   :  { %v94_v19 = vcvt.s32.f32 %v91_v17  ;;  %v95_v20 = vcvt.s32.f32 %v92_v18 }
  0x98   :  { %192 = vmatprep.mubr.f32.mxu0 %v95_v20 }
  0x99   :  { %193 = vmatmul.mubr.f32.vlgmr.msra.gmra.mxu0 %v94_v19 }
 0x159   :  { %v236_v21 = vpop.f32.mrf.mxu0 }
 0x15b   :  { %v237_v22 = vpop.f32.mrf.mxu0 }
 0x15c   :  { %v238_v23 = vadd.f32 %v237_v22, %v236_v21 }
 0x15e   :  { %199 = vst [vmem:[%s401_s2] sm:$0xff] %v238_v23 }

</bundles_post_ra>
